<compile_context>
chip_gen: v5e
topology: v5e:2x2
jax: 0.10.0
libtpu: 0.0.40
codegen_flags: <defaults>
</compile_context>

<pallas_src>
import math

import jax
import jax.numpy as jnp
from jax import lax
from jax.experimental import pallas as pl
from jax.experimental.pallas import tpu as pltpu


def cam_kernel(q_ref, k_ref, w_ref, b_ref, out_ref, att_acc):
    # q_ref / k_ref : (C, N) current target / source tile (input dtype)
    # w_ref         : (C, C) 1x1-conv weight for target i
    # b_ref         : (C, 1) 1x1-conv bias for target i
    # out_ref       : (C, N) output tile for (i, b)
    # att_acc       : (C, C) f32 VMEM scratch, accumulated over sources j
    j = pl.program_id(2)

    @pl.when(j == 0)
    def _():
        att_acc[...] = jnp.zeros_like(att_acc)

    q = q_ref[...]                                             # (C, N)
    k = k_ref[...]                                             # (C, N)

    # energy = Q @ K^T (contract over N) -- MXU, f32 accumulation.
    energy = lax.dot_general(q, k, (((1,), (1,)), ((), ())),
                             preferred_element_type=jnp.float32)   # (C, C)

    # Numerically-stable softmax over the source-channel axis, accumulated.
    e_max = jnp.max(energy, axis=-1, keepdims=True)
    p = jnp.exp(energy - e_max)
    inv = pl.reciprocal(jnp.sum(p, axis=-1, keepdims=True), approx=True)
    att_acc[...] += p * inv

    @pl.when(j == pl.num_programs(2) - 1)
    def _():
        # 1x1 conv == per-pixel channel mixing: value = W @ q + bias.
        value = jnp.dot(w_ref[...], q,
                        preferred_element_type=jnp.float32)        # (C, N)
        value = value + b_ref[...].astype(jnp.float32)
        out = jnp.dot(att_acc[...], value,
                      preferred_element_type=jnp.float32)          # (C, N)
        out_ref[...] = out.astype(out_ref.dtype)


def cam_module_forward(feat_sources, feat_targets, weights, biases):
    """feat_sources/feat_targets: lists of (B, C, H, W) arrays (NCHW).
    weights: (T, C, C) 1x1-conv kernels; biases: (T, C) biases.
    Returns (list of (B, C, H, W) feats, (T, S) alphas)."""
    T = len(feat_targets)
    S = len(feat_sources)
    B, C, H, W = feat_targets[0].shape
    N = H * W
    dtype = feat_targets[0].dtype

    tgt = jnp.stack([f.reshape(B, C, N) for f in feat_targets], axis=0)  # (T,B,C,N)
    src = jnp.stack([f.reshape(B, C, N) for f in feat_sources], axis=0)  # (S,B,C,N)
    w = jnp.asarray(weights).reshape(T, C, C).astype(dtype)
    b = jnp.asarray(biases).reshape(T, C, 1).astype(dtype)

    # VMEM budget: 3 double-buffered (C, N) tiles + params + f32 accumulator.
    itemsize = jnp.dtype(dtype).itemsize
    need = (3 * 2 * C * N + 2 * (C * C + C)) * itemsize + C * C * 4
    vmem_limit = int(min(max(2 * need, 16 << 20), 96 << 20))
    # NOTE: for very large H*W (a (C, N) slab that no longer fits ~24 MiB on
    # v7x's 64 MiB VMEM), additionally tile N: reduction grid axis for the
    # energy phase, parallel output-tile axis for the value/out phase.

    out = pl.pallas_call(
        cam_kernel,
        out_shape=jax.ShapeDtypeStruct((T, B, C, N), dtype),
        grid_spec=pltpu.PrefetchScalarGridSpec(
            num_scalar_prefetch=0,
            grid=(T, B, S),
            in_specs=[
                # target (query) tile: resident across the whole S loop
                pl.BlockSpec((None, None, C, N), lambda i, bb, j: (i, bb, 0, 0)),
                # source (key) tile: streams over S
                pl.BlockSpec((None, None, C, N), lambda i, bb, j: (j, bb, 0, 0)),
                # 1x1-conv weight / bias for target i
                pl.BlockSpec((None, C, C), lambda i, bb, j: (i, 0, 0)),
                pl.BlockSpec((None, C, 1), lambda i, bb, j: (i, 0, 0)),
            ],
            out_specs=pl.BlockSpec((None, None, C, N),
                                   lambda i, bb, j: (i, bb, 0, 0)),
            scratch_shapes=[pltpu.VMEM((C, C), jnp.float32)],
        ),
        compiler_params=pltpu.CompilerParams(
            dimension_semantics=("parallel", "parallel", "arbitrary"),
            vmem_limit_bytes=vmem_limit,
        ),
    )(tgt, src, w, b)

    # alphas: mean(Q K^T) factorises exactly into channel-sums -> tiny glue.
    qs = tgt.astype(jnp.float32).sum(axis=2)                   # (T, B, N)
    ks = src.astype(jnp.float32).sum(axis=2)                   # (S, B, N)
    means = jnp.einsum("tbn,sbn->ts", qs, ks) / float(B * C * C)   # (T, S)
    ret_alphas = jax.nn.softmax(means, axis=-1)                # (T, S)

    ret_feats = [out[i].reshape(B, C, H, W) for i in range(T)]
    return ret_feats, ret_alphas


if __name__ == "__main__":
    # small shapes consistent with the module: num=2 targets, 2 sources,
    # B=2, C=4, H=W=16  (N = 256)
    B, C, H, W = 2, 4, 16, 16
    T, S = 2, 2

    key = jax.random.PRNGKey(0)
    k_t, k_s, k_w, k_b = jax.random.split(key, 4)

    feat_targets = [
        jax.random.normal(jax.random.fold_in(k_t, i), (B, C, H, W), jnp.float32)
        for i in range(T)
    ]
    feat_sources = [
        jax.random.normal(jax.random.fold_in(k_s, j), (B, C, H, W), jnp.float32)
        for j in range(S)
    ]

    # deterministic Conv2d(C, C, kernel_size=1) params (PyTorch-style uniform init)
    bound = 1.0 / math.sqrt(C)
    weights = jax.random.uniform(k_w, (T, C, C), jnp.float32, -bound, bound)
    biases = jax.random.uniform(k_b, (T, C), jnp.float32, -bound, bound)

    ret_feats, ret_alphas = cam_module_forward(feat_sources, feat_targets,
                                               weights, biases)
    for f in ret_feats:
        jax.block_until_ready(f)
    jax.block_until_ready(ret_alphas)

    assert ret_feats[0].shape == (B, C, H, W)
    assert ret_alphas.shape == (T, S)
    print("KERNEL_OK")
</pallas_src>

<mosaic_0001>
module attributes {stable_mosaic.version = 11 : i64} {
  func.func @cam_kernel(%arg0: i32, %arg1: i32, %arg2: i32, %arg3: memref<1x1x4x256xf32, #tpu.memory_space<vmem>>, %arg4: memref<1x1x4x256xf32, #tpu.memory_space<vmem>>, %arg5: memref<1x4x4xf32, #tpu.memory_space<vmem>>, %arg6: memref<1x4x1xf32, #tpu.memory_space<vmem>>, %arg7: memref<1x1x4x256xf32, #tpu.memory_space<vmem>>, %arg8: memref<4x4xf32, #tpu.memory_space<vmem>>) attributes {dimension_semantics = [#tpu.dimension_semantics<parallel>, #tpu.dimension_semantics<parallel>, #tpu.dimension_semantics<arbitrary>], iteration_bounds = array<i64: 2, 2, 2>, scalar_prefetch = 0 : i64, scratch_operands = 1 : i64, tpu.core_type = #tpu.core_type<tc>, window_params = [{transform_indices = @transform_0, window_bounds = array<i64: 1, 1, 4, 256>}, {transform_indices = @transform_1, window_bounds = array<i64: 1, 1, 4, 256>}, {transform_indices = @transform_2, window_bounds = array<i64: 1, 4, 4>}, {transform_indices = @transform_3, window_bounds = array<i64: 1, 4, 1>}, {transform_indices = @transform_4, window_bounds = array<i64: 1, 1, 4, 256>}]} {
    %c0_i32 = arith.constant 0 : i32
    %0 = arith.cmpi eq, %arg2, %c0_i32 : i32
    %1 = arith.extui %0 : i1 to i32
    %c0_i32_0 = arith.constant 0 : i32
    %2 = arith.cmpi ne, %1, %c0_i32_0 : i32
    scf.if %2 {
      %cst_15 = arith.constant 0.000000e+00 : f32
      %24 = vector.broadcast %cst_15 : f32 to vector<4x4xf32>
      %c0_16 = arith.constant 0 : index
      %c0_17 = arith.constant 0 : index
      %25 = vector.load %arg8[%c0_16, %c0_17] : memref<4x4xf32, #tpu.memory_space<vmem>>, vector<4x4xf32>
      tpu.vector_store %arg8[%c0_16, %c0_17], %24 {strides = array<i32>} : memref<4x4xf32, #tpu.memory_space<vmem>>, vector<4x4xf32>,
    } else {
    }
    %c0 = arith.constant 0 : index
    %c0_1 = arith.constant 0 : index
    %c0_2 = arith.constant 0 : index
    %c0_3 = arith.constant 0 : index
    %3 = vector.load %arg3[%c0, %c0_1, %c0_2, %c0_3] : memref<1x1x4x256xf32, #tpu.memory_space<vmem>>, vector<1x1x4x256xf32>
    %4 = vector.shape_cast %3 : vector<1x1x4x256xf32> to vector<4x256xf32>
    %c0_4 = arith.constant 0 : index
    %c0_5 = arith.constant 0 : index
    %c0_6 = arith.constant 0 : index
    %c0_7 = arith.constant 0 : index
    %5 = vector.load %arg4[%c0_4, %c0_5, %c0_6, %c0_7] : memref<1x1x4x256xf32, #tpu.memory_space<vmem>>, vector<1x1x4x256xf32>
    %6 = vector.shape_cast %5 : vector<1x1x4x256xf32> to vector<4x256xf32>
    %cst = arith.constant dense<0.000000e+00> : vector<4x4xf32>
    %7 = tpu.matmul %4, %6, %cst {dimension_numbers = #tpu.dot_dimension_numbers<[1], [1], [0], [0], [0, 0, 1, 0], [], []>} : vector<4x256xf32>, vector<4x256xf32>, vector<4x4xf32> -> vector<4x4xf32>
    %cst_8 = arith.constant dense<0xFF800000> : vector<4xf32>
    %8 = vector.multi_reduction <maximumf>, %7, %cst_8 [1] : vector<4x4xf32> to vector<4xf32>
    %9 = vector.shape_cast %8 : vector<4xf32> to vector<4x1xf32>
    %10 = vector.broadcast %9 : vector<4x1xf32> to vector<4x4xf32>
    %11 = arith.subf %7, %10 : vector<4x4xf32>
    %12 = math.exp %11 : vector<4x4xf32>
    %cst_9 = arith.constant dense<0.000000e+00> : vector<4xf32>
    %13 = vector.multi_reduction <add>, %12, %cst_9 [1] : vector<4x4xf32> to vector<4xf32>
    %14 = vector.shape_cast %13 : vector<4xf32> to vector<4x1xf32>
    %15 = tpu.reciprocal %14 {approx = true} : vector<4x1xf32> -> vector<4x1xf32>
    %c0_10 = arith.constant 0 : index
    %c0_11 = arith.constant 0 : index
    %16 = vector.load %arg8[%c0_10, %c0_11] : memref<4x4xf32, #tpu.memory_space<vmem>>, vector<4x4xf32>
    %17 = vector.broadcast %15 : vector<4x1xf32> to vector<4x4xf32>
    %18 = arith.mulf %12, %17 : vector<4x4xf32>
    %19 = arith.addf %16, %18 : vector<4x4xf32>
    %c0_12 = arith.constant 0 : index
    %c0_13 = arith.constant 0 : index
    %20 = vector.load %arg8[%c0_12, %c0_13] : memref<4x4xf32, #tpu.memory_space<vmem>>, vector<4x4xf32>
    tpu.vector_store %arg8[%c0_12, %c0_13], %19 {strides = array<i32>} : memref<4x4xf32, #tpu.memory_space<vmem>>, vector<4x4xf32>,
    %c1_i32 = arith.constant 1 : i32
    %21 = arith.cmpi eq, %arg2, %c1_i32 : i32
    %22 = arith.extui %21 : i1 to i32
    %c0_i32_14 = arith.constant 0 : i32
    %23 = arith.cmpi ne, %22, %c0_i32_14 : i32
    scf.if %23 {
      %c0_15 = arith.constant 0 : index
      %c0_16 = arith.constant 0 : index
      %c0_17 = arith.constant 0 : index
      %24 = vector.load %arg5[%c0_15, %c0_16, %c0_17] : memref<1x4x4xf32, #tpu.memory_space<vmem>>, vector<1x4x4xf32>
      %25 = vector.shape_cast %24 : vector<1x4x4xf32> to vector<4x4xf32>
      %cst_18 = arith.constant dense<0.000000e+00> : vector<4x256xf32>
      %26 = tpu.matmul %25, %4, %cst_18 {dimension_numbers = #tpu.dot_dimension_numbers<[1], [0], [0], [1], [0, 0, 1, 1], [], []>} : vector<4x4xf32>, vector<4x256xf32>, vector<4x256xf32> -> vector<4x256xf32>
      %c0_19 = arith.constant 0 : index
      %c0_20 = arith.constant 0 : index
      %c0_21 = arith.constant 0 : index
      %27 = vector.load %arg6[%c0_19, %c0_20, %c0_21] : memref<1x4x1xf32, #tpu.memory_space<vmem>>, vector<1x4x1xf32>
      %28 = vector.shape_cast %27 : vector<1x4x1xf32> to vector<4x1xf32>
      %29 = vector.broadcast %28 : vector<4x1xf32> to vector<4x256xf32>
      %30 = arith.addf %26, %29 : vector<4x256xf32>
      %c0_22 = arith.constant 0 : index
      %c0_23 = arith.constant 0 : index
      %31 = vector.load %arg8[%c0_22, %c0_23] : memref<4x4xf32, #tpu.memory_space<vmem>>, vector<4x4xf32>
      %cst_24 = arith.constant dense<0.000000e+00> : vector<4x256xf32>
      %32 = tpu.matmul %31, %30, %cst_24 {dimension_numbers = #tpu.dot_dimension_numbers<[1], [0], [0], [1], [0, 0, 1, 1], [], []>} : vector<4x4xf32>, vector<4x256xf32>, vector<4x256xf32> -> vector<4x256xf32>
      %c0_25 = arith.constant 0 : index
      %c0_26 = arith.constant 0 : index
      %c0_27 = arith.constant 0 : index
      %c0_28 = arith.constant 0 : index
      %33 = vector.load %arg7[%c0_25, %c0_26, %c0_27, %c0_28] : memref<1x1x4x256xf32, #tpu.memory_space<vmem>>, vector<1x1x4x256xf32>
      %34 = vector.shape_cast %33 : vector<1x1x4x256xf32> to vector<4x256xf32>
      %35 = vector.shape_cast %32 : vector<4x256xf32> to vector<1x1x4x256xf32>
      tpu.vector_store %arg7[%c0_25, %c0_26, %c0_27, %c0_28], %35 {strides = array<i32>} : memref<1x1x4x256xf32, #tpu.memory_space<vmem>>, vector<1x1x4x256xf32>,
    } else {
    }
    return
  }
  func.func @transform_0(%arg0: i32, %arg1: i32, %arg2: i32) -> (i32, i32, i32, i32) {
    %c0_i32 = arith.constant 0 : i32
    %c0_i32_0 = arith.constant 0 : i32
    %c0_i32_1 = arith.constant 0 : i32
    return %arg0, %arg1, %c0_i32, %c0_i32_0 : i32, i32, i32, i32
  }
  func.func @transform_1(%arg0: i32, %arg1: i32, %arg2: i32) -> (i32, i32, i32, i32) {
    %c0_i32 = arith.constant 0 : i32
    %c0_i32_0 = arith.constant 0 : i32
    %c0_i32_1 = arith.constant 0 : i32
    return %arg2, %arg1, %c0_i32, %c0_i32_0 : i32, i32, i32, i32
  }
  func.func @transform_2(%arg0: i32, %arg1: i32, %arg2: i32) -> (i32, i32, i32) {
    %c0_i32 = arith.constant 0 : i32
    %c0_i32_0 = arith.constant 0 : i32
    %c0_i32_1 = arith.constant 0 : i32
    return %arg0, %c0_i32, %c0_i32_0 : i32, i32, i32
  }
  func.func @transform_3(%arg0: i32, %arg1: i32, %arg2: i32) -> (i32, i32, i32) {
    %c0_i32 = arith.constant 0 : i32
    %c0_i32_0 = arith.constant 0 : i32
    %c0_i32_1 = arith.constant 0 : i32
    return %arg0, %c0_i32, %c0_i32_0 : i32, i32, i32
  }
  func.func @transform_4(%arg0: i32, %arg1: i32, %arg2: i32) -> (i32, i32, i32, i32) {
    %c0_i32 = arith.constant 0 : i32
    %c0_i32_0 = arith.constant 0 : i32
    %c0_i32_1 = arith.constant 0 : i32
    return %arg0, %arg1, %c0_i32, %c0_i32_0 : i32, i32, i32, i32
  }
}

</mosaic_0001>

<bundles_post_ra>
// kernel: tpu_custom_call.1
= control target key start
LH: loop header
LB: loop body
LE: loop exit
PB: predicated region body
PF: predicated region fallthrough
CT: control target
= control target key end

     0   :  { %s1356_s0 = inlined_call_operand.hbm [shape: f32[2,2,4,256], index: 0, kind: input, shape index: {}]   ;;  %s1357_s1 = inlined_call_operand.hbm [shape: f32[2,2,4,256], index: 1, kind: input, shape index: {}]   ;;  %s1358_s2 = inlined_call_operand.vmem [shape: f32[2,4,4], index: 2, kind: input, shape index: {}]   ;;  %s1359_s3 = inlined_call_operand.vmem [shape: f32[2,4,1], index: 3, kind: input, shape index: {}]   ;;  %s1360_s4 = inlined_call_operand.hbm [shape: f32[2,2,4,256], index: 4, kind: output, shape index: {}]  }
   0x1   :  { %1373 = sst [smem:[#allocation22_spill]] %s1356_s0 }
   0x2   :  { %1374 = sst [smem:[#allocation23_spill]] %s1358_s2 }
   0x3   :  { %1375 = sst [smem:[#allocation24_spill]] %s1359_s3 }
   0x4   :  { %1376 = sst [smem:[#allocation25_spill]] %s1360_s4 }
   0x5   :  { %9 = vsyncpa [#allocation4], 0 }
   0x6   :  { %11 = vsyncpa [#allocation4 + $0x1], 0 }
   0x7   :  { %12 = vsyncpa [#allocation7], 0 }
   0x8   :  { %14 = vsyncpa [#allocation7 + $0x1], 0 }
   0x9   :  { %15 = vsyncpa [#allocation5], 0 }
   0xa   :  { %17 = vsyncpa [#allocation5 + $0x1], 0  ;;  %s1070_s15 = smov 0   ;;  %s1072_s16 = smov 0  }
   0xb   :  { %s1074_s17 = smov 0   ;;  %s1076_s18 = smov 0  }
   0xc   :  { %s1078_s19 = smov 0   ;;  %s1080_s20 = smov 0  }
   0xd   :  { %s1082_s21 = smov 0   ;;  %s1084_s22 = smov 0  }
   0xe   :  { %s1086_s23 = smov 0   ;;  %s1088_s24 = smov 0  }
   0xf   :  { %s1090_s25 = smov 0   ;;  %s1092_s26 = smov 0  }
  0x10   :  { %s1094_s27 = smov 0  }
  0x11 LB: > { %1377 = sst [smem:[#allocation12_spill]] %s1005_s18  ;;  %s675_s28 = sadd.s32 4294967295, %s1041_s27   ;;  %s1041_s27 = sphi %s1094_s27, %s23_s27   ;;  %s1037_s26 = sphi %s1092_s26, %s1425_s26   ;;  %s1033_s25 = sphi %s1090_s25, %s1424_s25   ;;  %s1029_s24 = sphi %s1088_s24, %s1414_s24   ;;  %s1025_s23 = sphi %s1086_s23, %s1423_s23   ;;  %s1021_s22 = sphi %s1084_s22, %s1422_s22   ;;  %s1017_s21 = sphi %s1082_s21, %s1413_s21   ;;  %s1013_s20 = sphi %s1080_s20, %s1421_s20   ;;  %s1009_s19 = sphi %s1078_s19, %s1420_s19   ;;  %s1005_s18 = sphi %s1076_s18, %s1419_s18   ;;  %s1001_s17 = sphi %s1074_s17, %s1418_s17   ;;  %s997_s16 = sphi %s1072_s16, %s1417_s16   ;;  %s993_s15 = sphi %s1070_s15, %s1416_s15  }
  0x12   : > { %1378 = sst [smem:[#allocation13_spill]] %s1017_s21  ;;  %s676_s29 = sadd.s32 4294967294, %s1041_s27  }
  0x13   : > { %1379 = sst [smem:[#allocation14_spill]] %s1021_s22  ;;  %p58_p0 = scmp.ne.s32.totalorder %s1013_s20, %s1009_s19 }
  0x14   : > { %1380 = sst [smem:[#allocation15_spill]] %s1025_s23  ;;  %p59_p1 = scmp.eq.s32.totalorder %s1041_s27, 0 }
  0x15   : > { %1381 = sst [smem:[#allocation16_spill]] %s1029_s24  ;;  %p64_p2 = scmp.ne.s32.totalorder %s1009_s19, %s1005_s18 }
  0x16   : > { %p1145_p3 = scmp.eq.s32.totalorder %s675_s28, 0  ;;  %p170_p4 = scmp.eq.s32.totalorder %s675_s28, 7 }
  0x17   : > { %p1151_p5 = por %p59_p1, %p58_p0  ;;  %p176_p6 = scmp.eq.s32.totalorder %s676_s29, 7 }
  0x18   : > { %p1157_p7 = por %p1145_p3, %p64_p2  ;;  %p1161_p8 = por %p170_p4, %p58_p0 }
  0x19   : > { %p1165_p9 = por %p176_p6, %p64_p2  ;;  %p726_p10 = scmp.lt.s32.totalorder %s1041_s27, 8 }
  0x1a   : > { %s1385_s10 = scalar_select %p1161_p8, 1, 0 }
  0x1b   : > { %s1387_s11 = scalar_select %p1165_p9, 1, 0 }
  0x1c   : > { %1386 = sst [smem:[#allocation17_spill]] %s1385_s10  ;;  %s196_s12 = sand.u32 1, %s1013_s20  }
  0x1d   : > { %1388 = sst [smem:[#allocation18_spill]] %s1387_s11  ;;  %s679_s13 = sshll.u32 %s196_s12, 3 }
  0x1e   : > { %s1363_s14 = sshll.u32 %s1033_s25, 1  ;;  %s681_s28 = sshll.u32 %s1037_s26, 2 }
  0x1f   : > { %s200_s29 = scalar_lea.vmem [#allocation3], %s679_s13  ;;  %s205_s5 = sadd.s32 %s681_s28, %s1363_s14 }
  0x20   : > { %s211_s6 = sshll.u32 %s200_s29, 4  ;;  %s682_s30 = sshll.u32 %s205_s5, 2  ;;  %s212_s6 = int_to_ptr.vmem [resolvable:$true] %s211_s6 }
  0x21   : > { %p716_p11 = pnand %p726_p10, %p1151_p5  ;;  %s1389_s0 = sld [smem:[#allocation22_spill]] }
  0x22   : > { %p687_p12 = scmp.ge.s32.totalorder %s1041_s27, 1  ;;  %p252_p13 = scmp.lt.s32.totalorder %s1041_s27, 9 }
  0x23   : > { %s197_s28 = scalar_lea.sflag [#allocation4], %s196_s12  ;;  %s35_s18 = sadd.s32 1, %s1029_s24 }
  0x24   : > { %p1184_p0 = pnand %p687_p12, %p252_p13  ;;  %p36_p2 = scmp.ge.s32.totalorder %s35_s18, 2 }
  0x25   : > { %p86_p4 = scmp.ne.s32.totalorder %s1001_s17, %s997_s16  ;;  %p92_p5 = scmp.ne.s32.totalorder %s997_s16, %s993_s15 }
  0x26   : > { %s1427_s18 = smov (%p36_p2, %s35_s18), 0  ;;  %s1392_s8 = sadd.s32 1, %s1033_s25 }
  0x27   : > { %s207_s13 = scalar_lea.hbm %s1389_s0, %s682_s30  ;;  %s79_s30 = sadd.s32 1, %s1001_s17 }
  0x28   : > { %s209_s29 = sshll.u32 %s207_s13, 4  ;;  %1391 = sst [smem:[#allocation19_spill]] %s1427_s18  ;;  %s210_s29 = int_to_ptr.hbm [resolvable:$true] %s209_s29 }
  0x29   : > { %718 = dma.hbm_to_vmem [thread:$0]  (!%p716_p11), %s210_s29, 128, %s212_s6, %s197_s28  }
  0x2a   : > { %s1429_s8 = smov (!%p36_p2, %s1392_s8), %s1033_s25  ;;  %s74_s6 = ssub.s32 %s1029_s24, %s1427_s18 }
  0x2b   : > { %p1203_p6 = por %p86_p4, %p59_p1  ;;  %p40_p11 = scmp.ge.s32.totalorder %s1429_s8, 2 }
  0x2c   : > { %p1209_p12 = por %p92_p5, %p1145_p3  ;;  %s218_s15 = sand.u32 1, %s1001_s17  }
  0x2d   : > { %s685_s13 = sshll.u32 %s1029_s24, 2  ;;  %s1431_s8 = smov (%p40_p11, %s1429_s8), 0 }
  0x2e   : > { %s1394_s12 = scalar_select %p1209_p12, 1, 0 }
  0x2f   : > { %1396 = sst [smem:[#allocation21_spill]] %s1431_s8  ;;  %s1397_s29 = sadd.s32 1, %s1037_s26 }
  0x30   : > { %1395 = sst [smem:[#allocation20_spill]] %s1394_s12  ;;  %s1433_s29 = smov (!%p40_p11, %s1397_s29), %s1037_s26 }
  0x31   : > { %s47_s28 = ssub.s32 %s1033_s25, %s1431_s8  ;;  %p44_p1 = scmp.ge.s32.totalorder %s1433_s29, 2 }
  0x32   : > { %s76_s14 = sor.u32 %s74_s6, %s47_s28  ;;  %s683_s7 = sshll.u32 %s218_s15, 3 }
  0x33   : > { %p77_p13 = scmp.eq.s32.totalorder %s76_s14, 0  ;;  %s1435_s29 = smov (%p44_p1, %s1433_s29), 0 }
  0x34   : > { %s46_s18 = ssub.s32 %s1037_s26, %s1435_s29  ;;  %s1398_s4 = sshll.u32 %s1033_s25, 1 }
  0x35   : > { %s1225_s0 = scalar_select %p77_p13, %s1001_s17, %s79_s30  }
  0x36   : > { %s48_s24 = sor.u32 %s47_s28, %s46_s18  ;;  %s227_s10 = sadd.s32 %s685_s13, %s1398_s4 }
  0x37   : > { %p49_p3 = scmp.eq.s32.totalorder %s48_s24, 0  ;;  %s686_s22 = sshll.u32 %s227_s10, 2 }
  0x38   : > { %s229_s8 = scalar_lea.hbm %s1357_s1, %s686_s22  ;;  %s222_s6 = scalar_lea.vmem [#allocation6], %s683_s7 }
  0x39   : > { %s233_s14 = sshll.u32 %s222_s6, 4  ;;  %s1399_s2 = sadd.s32 1, %s1013_s20  ;;  %s234_s14 = int_to_ptr.vmem [resolvable:$true] %s233_s14 }
  0x3a   : > { %s1237_s23 = scalar_select %p49_p3, %s1013_s20, %s1399_s2  }
  0x3b   : > { %s231_s12 = sshll.u32 %s229_s8, 4  ;;  %p719_p2 = pnand %p726_p10, %p1203_p6  ;;  %s232_s12 = int_to_ptr.hbm [resolvable:$true] %s231_s12 }
  0x3c   : > { %s219_s18 = scalar_lea.sflag [#allocation7], %s218_s15  ;;  %256 = sbr.rel (%p1184_p0) target bundleno = 791 (0x317), region = 36 }
  0x3d   : > { %721 = dma.hbm_to_vmem [thread:$0]  (!%p719_p2), %s232_s12, 128, %s234_s14, %s219_s18  }
  0x3e   : > { %s1246_s3 = sand.u32 (!%p1184_p0), 1, %s1009_s19  }
  0x3f   : > { %s688_s4 = sshll.u32 (!%p1184_p0), %s1246_s3, 3  ;;  %s259_s2 = scalar_lea.sflag (!%p1184_p0), [#allocation4], %s1246_s3 }
  0x40   : > { %s262_s21 = scalar_lea.vmem (!%p1184_p0), [#allocation3], %s688_s4 }
  0x41   : > { %980 = dma.done.wait (%p1157_p7), %s259_s2, 128  }
  0x42   : > { %982 = vsyncadd (%p1157_p7), %s259_s2, 4294967168  ;;  %s268_s24 = sand.u32 1, %s997_s16  }
  0x43   : > { %s689_s10 = sshll.u32 %s268_s24, 3  ;;  %s269_s5 = scalar_lea.sflag [#allocation7], %s268_s24 }
  0x44   : > { %s272_s30 = scalar_lea.vmem [#allocation6], %s689_s10 }
  0x45   : > { %984 = dma.done.wait (%p1209_p12), %s269_s5, 128  }
  0x46   : > { %986 = vsyncadd (%p1209_p12), %s269_s5, 4294967168  ;;  %s1401_s8 = sld [smem:[#allocation15_spill]]  ;;  %s1271_s18 = scalar_lea.vmem [#allocation8], %s688_s4 }
  0x47   : > { %s1402_s9 = sld [smem:[#allocation23_spill]] }
  0x48   : > { %s1403_s6 = sld [smem:[#allocation24_spill]] }
  0x49   : > { %s1404_s2 = sld [smem:[#allocation13_spill]] }
  0x4c   : > { %p311_p10 = scmp.lt.s32.totalorder %s1401_s8, 1 }
  0x4e   : > { %s1437_s8 = smov (!%p311_p10, %s1401_s8), 1 }
  0x4f   : > { %s691_s11 = sshll.u32 %s1437_s8, 2  ;;  %p693_p7 = scmp.ne.s32.totalorder %s1404_s2, 0 }
  0x50   : > { %s1264_s13 = scalar_lea.vmem %s1402_s9, %s691_s11  ;;  %s1269_s14 = scalar_lea.vmem %s1403_s6, %s691_s11 }
  0x51   : > { %322 = sbr.rel (%p693_p7) target bundleno = 88 (0x58), region = 48 }
  0x56   : > { %vm323_vm0 = vcmask 27648   ;;  %v1043_v0 = vmov 0.0  }
  0x57   : > { %324 = vst.msk [vmem:[#allocation2] sm:$0xf] %vm323_vm0, %v1043_v0 }
  0x58 PF: > { %v325_v1 = vld [vmem:[%s262_s21] sm:$0xff]  ;;  %v326_v2 = vld [vmem:[%s272_s30] sm:$0xff]  ;;  %vm379_vm1 = vcmask 27648   ;;  %s1405_s4 = sld [smem:[#allocation13_spill]] }
  0x59   : > { %328 = vst [vmem:[#allocation1] ss:$2 sm:$0xff] %v325_v1 }
  0x5e   : > { %v390_v18 = vld [vmem:[#allocation2] sm:$0xf]  ;;  %p694_p0 = scmp.ne.s32.totalorder %s1405_s4, 1 }
  0x60   : > { %v329_v3 = vld.sshfl [vmem:[#allocation1] sm:$0xff pattern:$0x75316420]  ;;  %v330_v4 = vld.sshfl [vmem:[#allocation1 + $0x8] sm:$0xff pattern:$0x75316420] }
  0x61   : > { %334 = vst [vmem:[#allocation1] ss:$2 sm:$0xff] %v326_v2 }
  0x68   : > { %v335_v5 = vld.sshfl [vmem:[#allocation1] sm:$0xff pattern:$0x75316420]  ;;  %v336_v6 = vld.sshfl [vmem:[#allocation1 + $0x8] sm:$0xff pattern:$0x75316420] }
  0x69   : > { %354 = vmatpush.xpose.msra.mxu0 %v335_v5  ;;  %374 = vmatpush.xpose.msra.mxu1 %v336_v6 }
  0x6c   : > { %355 = vmatmul.f32.vlgmr.msra.gmra.mxu0 %v329_v3  ;;  %375 = vmatmul.f32.vlgmr.msra.gmra.mxu1 %v330_v4 }
  0xe9   : > { %v356_v7 = vpop.f32.mrf.mxu0  ;;  %v376_v8 = vpop.f32.mrf.mxu1 }
  0xea   : > { %v377_v9 = vadd.f32 %v376_v8, %v356_v7 }
  0xec   : > { %v380_v10 = vsel %vm379_vm1, %v377_v9, -inf }
  0xed   : > { %381 = vmax.xlane.f32.xlu0 %v380_v10 }
 0x160   : > { %v382_v11 = vpop.xlane.xlu0 %381 }
 0x161   : > { %v383_v12 = vsub.f32 %v377_v9, %v382_v11 }
 0x163   : > { %v384_v13 = vmul.f32 1.442695, %v383_v12 }
 0x165   : > { %834 = vpow2.f32 %v384_v13 }
 0x16b   : > { %v835_v14 = vpop.eup %834 }
 0x16c   : > { %v386_v15 = vsel %vm379_vm1, %v835_v14, 0.0 }
 0x16d   : > { %387 = vadd.xlane.f32.xlu0 %v386_v15 }
 0x1e0   : > { %v388_v16 = vpop.xlane.xlu0 %387 }
 0x1e1   : > { %836 = vrcp.f32 %v388_v16 }
 0x1e7   : > { %v837_v17 = vpop.eup %836 }
 0x1e8   : > { %v391_v19 = vmul.f32 %v837_v17, %v835_v14  ;;  %397 = sbr.rel (%p694_p0) target bundleno = 767 (0x2ff), region = 52 }
 0x1ea   : > { %v392_v20 = vadd.f32 %v391_v19, %v390_v18 }
 0x1ec   : > { %393 = vst.msk [vmem:[#allocation2] sm:$0xf] %vm379_vm1, %v392_v20 }
 0x1ed   : > { %405 = vst [vmem:[#allocation1] ss:$2 sm:$0xff] %v325_v1  ;;  %v399_v21 = vld [vmem:[%s1269_s14] sm:$0xf]  ;;  %v1044_v22 = vmov 0   ;;  %vm412_vm2 = vcmask 1043456  }
 0x1ee   : > { %838 = vset.pattern.permute.xlu0 %v1044_v22  ;;  %v398_v23 = vld [vmem:[%s1264_s13] sm:$0xf]  ;;  %vm408_vm3 = vcmask 31744  }
 0x1ef   : > { %402 = vperm.xlu0 %838, %v399_v21  }
 0x1f3   : > { %v457_v31 = vld [vmem:[#allocation2] sm:$0xf] }
 0x1f4   : > { %v406_v24 = vld.sshfl [vmem:[#allocation1] sm:$0xff pattern:$0x75316420]  ;;  %v407_v25 = vld.sshfl [vmem:[#allocation1 + $0x8] sm:$0xff pattern:$0x75316420] }
 0x1f5   : > { %695 = vmatpush.msk.msra.mxu0 %vm412_vm2, %v406_v24  ;;  %697 = vmatpush.msk.msra.mxu1 %vm412_vm2, %v407_v25 }
 0x1f6   : > { %696 = vmatmul.msk.f32.vlgmr.msra.gmra.mxu0 %vm408_vm3, %v398_v23  ;;  %698 = vmatmul.msk.f32.vlgmr.msra.gmra.mxu1 %vm408_vm3, %v398_v23 }
 0x261   : > { %v403_v26 = vpop.permute.xlu0 %402 }
 0x273   : > { %v434_v27 = vpop.f32.mrf.mxu0  ;;  %v454_v28 = vpop.f32.mrf.mxu1 }
 0x274   : > { %v435_v29 = vadd.f32 %v434_v27, %v403_v26  ;;  %v455_v30 = vadd.f32 %v454_v28, %v403_v26 }
 0x276   : > { %699 = vmatpush.msk.msra.mxu2 %vm412_vm2, %v435_v29  ;;  %701 = vmatpush.msk.msra.mxu3 %vm412_vm2, %v455_v30 }
 0x277   : > { %702 = vmatmul.msk.f32.vlgmr.msra.gmra.mxu3 %vm408_vm3, %v457_v31  ;;  %700 = vmatmul.msk.f32.vlgmr.msra.gmra.mxu2 %vm408_vm3, %v457_v31 }
 0x2fa   : > { %v504_v32 = vpop.f32.mrf.mxu3  ;;  %v484_v33 = vpop.f32.mrf.mxu2 }
 0x2fb   : > { %v509_v34 = vrot.slane %v504_v32, 4 }
 0x2fd   : > { %v510_v35 = vsel %vm412_vm2, %v484_v33, %v509_v34 }
 0x2fe   : > { %512 = vst [vmem:[%s1271_s18] sm:$0xff] %v510_v35 }
 0x2ff PF: > { %s1406_s21 = sld [smem:[#allocation14_spill]]  ;;  %s529_s30 = sshll.u32 %s1271_s18, 4  ;;  %s530_s30 = int_to_ptr.vmem [resolvable:$true] %s529_s30 }
 0x300   : > { %s1407_s22 = sld [smem:[#allocation15_spill]]  ;;  %s514_s7 = scalar_lea.sflag [#allocation5], %s1246_s3 }
 0x301   : > { %s1409_s9 = sld [smem:[#allocation25_spill]] }
 0x305   : > { %s704_s10 = sshll.u32 %s1406_s21, 1 }
 0x306   : > { %s705_s5 = sshll.u32 %s1407_s22, 2 }
 0x307   : > { %s525_s8 = sadd.s32 %s705_s5, %s704_s10  ;;  %s919_s18 = scalar_lea.hbm %s1409_s9, 32 }
 0x308   : > { %s706_s11 = sshll.u32 %s525_s8, 2 }
 0x309   : > { %s527_s13 = scalar_lea.hbm %s1409_s9, %s706_s11 }
 0x30a   : > { %s531_s28 = sshll.u32 %s527_s13, 4  ;;  %s532_s28 = int_to_ptr.hbm [resolvable:$true] %s531_s28 }
 0x30b   : > { %s913_s6 = sshra.s32 %s532_s28, 4  ;;  %s914_s6 = int_to_ptr.hbm [resolvable:$true] %s913_s6 }
 0x30c   : > { %s915_s14 = scalar_lea.hbm %s914_s6, 8  ;;  %p920_p11 = scmp.lt.s32.totalorder %s914_s6, %s1409_s9 }
 0x30d   : > { %p916_p4 = scmp.ne.s32.totalorder %s914_s6, %s915_s14  ;;  %p921_p12 = scmp.lt.s32.totalorder %s919_s18, %s915_s14 }
 0x30f   : > { %p917_p5 = pnand %p916_p4, %p1161_p8  ;;  %p922_p1 = por %p921_p12, %p920_p11 }
 0x311   : > { %p918_p6 = pneg %p917_p5 }
 0x313   : > { %p923_p13 = pnand %p922_p1, %p918_p6 }
 0x315   : > { %926 = shalt.err (!%p923_p13)
}
 0x316   : > { %713 = dma.vmem_to_hbm [thread:$0]  (%p1161_p8), %s530_s30, 128, %s532_s28, %s514_s7  }
 0x317 PF: > { %s1410_s3 = sld [smem:[#allocation12_spill]]  ;;  %p727_p3 = scmp.ge.s32.totalorder %s1041_s27, 2 }
 0x319   : > { %p723_p2 = pnand %p727_p3, %p1165_p9 }
 0x31b   : > { %p724_p10 = pneg %p723_p2 }
 0x31d   : > { %s543_s5 = sand.u32 1, %s1410_s3  }
 0x31e   : > { %s544_s8 = scalar_lea.sflag [#allocation5], %s543_s5 }
 0x31f   : > { %988 = dma.done.wait (%p724_p10), %s544_s8, 128  }
 0x320   : > { %990 = vsyncadd (%p724_p10), %s544_s8, 4294967168  ;;  %s23_s27 = sadd.s32 1, %s1041_s27   ;;  %s1413_s21 = sld [smem:[#allocation16_spill]] }
 0x321   : > { %p1312_p7 = scmp.ge.s32.totalorder %s23_s27, 10   ;;  %s1414_s24 = sld [smem:[#allocation19_spill]] }
 0x322   : > { %s1415_s30 = sld [smem:[#allocation21_spill]]  ;;  %s1416_s15 = smov %s997_s16 }
 0x323   : > { %s1417_s16 = smov %s1001_s17  ;;  %s1418_s17 = smov %s1225_s0 }
 0x324   : > { %s1419_s18 = smov %s1009_s19  ;;  %s1420_s19 = smov %s1013_s20 }
 0x325   : > { %s1421_s20 = smov %s1237_s23  ;;  %s1422_s22 = smov %s1033_s25 }
 0x326   : > { %s1423_s23 = smov %s1037_s26  ;;  %s1425_s26 = smov %s1435_s29 }
 0x327   :  { %22 = sbr.rel (!%p1312_p7) target bundleno = 17 (0x11), region = 108 }
 0x328   : > { %s1424_s25 = smov %s1415_s30 }
 0x32c   :  { %550 = vsyncpa [#allocation4], 1 }
 0x32d   :  { %552 = vsyncpa [#allocation4 + $0x1], 1 }
 0x32e   :  { %553 = vsyncpa [#allocation7], 1 }
 0x32f   :  { %555 = vsyncpa [#allocation7 + $0x1], 1 }
 0x330   :  { %556 = vsyncpa [#allocation5], 1 }
 0x331   :  { %558 = vsyncpa [#allocation5 + $0x1], 1 }

</bundles_post_ra>
